<compile_context>
chip_gen: v7x
topology: tpu7x:2x2x1
jax: 0.10.0
libtpu: 0.0.40
codegen_flags: <defaults>
</compile_context>

<pallas_src>
import functools
import math

import jax
import jax.numpy as jnp
from jax.experimental import pallas as pl
from jax.experimental.pallas import tpu as pltpu

_LN_EPS = 1e-5
_NEG_INF = -1e30
_GELU_C = math.sqrt(2.0 / math.pi)
_VMEM_LIMIT = 48 * 1024 * 1024          # safe on v5e/v6e/v7x, >> demo usage
_HIGHEST = jax.lax.Precision.HIGHEST    # reference-only


# ---------------------------------------------------------------------------
# helpers
# ---------------------------------------------------------------------------
def _pick_tile(dim, max_tile, mult, want_multi=False):
    """Largest divisor of `dim` that is a multiple of `mult` and <= max_tile.

    If `want_multi`, avoid a single-step grid when `dim` splits cleanly so the
    two v7x TensorCores both get work on 'parallel' axes.
    """
    if dim <= mult:
        return dim
    best = None
    t = (min(max_tile, dim) // mult) * mult
    while t >= mult:
        if dim % t == 0:
            best = t
            break
        t -= mult
    if best is None:
        # TODO(synk): pad + mask ragged dims instead of one full-dim block.
        return dim
    if want_multi and best == dim and dim % (2 * mult) == 0:
        best = dim // 2
    return best


def _gelu_tanh(x):
    # tanh-approx GELU: transcendental lands on the EUP slot.
    return 0.5 * x * (1.0 + jnp.tanh(_GELU_C * (x + 0.044715 * x * x * x)))


# ---------------------------------------------------------------------------
# kernel 1: fused LayerNorm -> matmul (+ optional GELU), N-tiled weights
# ---------------------------------------------------------------------------
def _ln_matmul_kernel(x_ref, g_ref, b_ref, w_ref, wb_ref, o_ref, *, apply_gelu):
    x = x_ref[...].astype(jnp.float32)
    mu = jnp.mean(x, axis=-1, keepdims=True)
    xc = x - mu
    var = jnp.mean(xc * xc, axis=-1, keepdims=True)
    y = (xc * jax.lax.rsqrt(var + _LN_EPS)) * g_ref[...].astype(jnp.float32) \
        + b_ref[...].astype(jnp.float32)
    out = jnp.dot(y.astype(jnp.bfloat16), w_ref[...],
                  preferred_element_type=jnp.float32)
    out = out + wb_ref[...].astype(jnp.float32)
    if apply_gelu:
        out = _gelu_tanh(out)
    o_ref[...] = out.astype(o_ref.dtype)


def ln_matmul(x2d, g, b, w_bf16, wb, *, apply_gelu=False):
    m, d = x2d.shape
    n = w_bf16.shape[1]
    tm = _pick_tile(m, 256, 8, want_multi=True)
    tn = _pick_tile(n, 512, 128, want_multi=True)
    kernel = functools.partial(_ln_matmul_kernel, apply_gelu=apply_gelu)
    return pl.pallas_call(
        kernel,
        out_shape=jax.ShapeDtypeStruct((m, n), jnp.bfloat16),
        grid_spec=pltpu.PrefetchScalarGridSpec(
            num_scalar_prefetch=0,
            grid=(m // tm, n // tn),
            in_specs=[
                pl.BlockSpec((tm, d), lambda i, j: (i, 0)),
                pl.BlockSpec((1, d), lambda i, j: (0, 0)),
                pl.BlockSpec((1, d), lambda i, j: (0, 0)),
                pl.BlockSpec((d, tn), lambda i, j: (0, j)),
                pl.BlockSpec((1, tn), lambda i, j: (0, j)),
            ],
            out_specs=pl.BlockSpec((tm, tn), lambda i, j: (i, j)),
        ),
        compiler_params=pltpu.CompilerParams(
            dimension_semantics=("parallel", "parallel"),
            vmem_limit_bytes=_VMEM_LIMIT),
    )(x2d, g.reshape(1, d), b.reshape(1, d), w_bf16, wb.reshape(1, n))


# ---------------------------------------------------------------------------
# kernel 2: flash-style causal attention, heads sliced straight out of qkv
# ---------------------------------------------------------------------------
def _flash_attn_kernel(q_ref, k_ref, v_ref, *rest, sm_scale, tq, tkv, has_mask):
    if has_mask:
        msk_ref, o_ref, m_sc, l_sc, acc_sc = rest
    else:
        msk_ref = None
        o_ref, m_sc, l_sc, acc_sc = rest

    qi = pl.program_id(2)
    ki = pl.program_id(3)

    @pl.when(ki == 0)
    def _():
        m_sc[...] = jnp.full_like(m_sc, _NEG_INF)
        l_sc[...] = jnp.zeros_like(l_sc)
        acc_sc[...] = jnp.zeros_like(acc_sc)

    # Skip KV blocks that lie entirely above the causal diagonal.
    @pl.when(ki * tkv <= qi * tq + (tq - 1))
    def _():
        s = jax.lax.dot_general(
            q_ref[...], k_ref[...], (((1,), (1,)), ((), ())),
            preferred_element_type=jnp.float32) * sm_scale
        row = qi * tq + jax.lax.broadcasted_iota(jnp.int32, (tq, tkv), 0)
        col = ki * tkv + jax.lax.broadcasted_iota(jnp.int32, (tq, tkv), 1)
        allowed = col <= row
        if msk_ref is not None:
            allowed = jnp.logical_and(allowed, msk_ref[...] > 0.0)
        s = jnp.where(allowed, s, jnp.float32(_NEG_INF))

        m_prev = m_sc[...]
        m_new = jnp.maximum(m_prev, jnp.max(s, axis=-1, keepdims=True))
        alpha = jnp.exp(m_prev - m_new)
        p = jnp.exp(s - m_new)
        l_sc[...] = alpha * l_sc[...] + jnp.sum(p, axis=-1, keepdims=True)
        acc_sc[...] = alpha * acc_sc[...] + jax.lax.dot_general(
            p.astype(jnp.bfloat16), v_ref[...], (((1,), (0,)), ((), ())),
            preferred_element_type=jnp.float32)
        m_sc[...] = m_new

    @pl.when(ki == pl.num_programs(3) - 1)
    def _():
        o_ref[...] = (acc_sc[...] *
                      pl.reciprocal(l_sc[...], approx=True)).astype(o_ref.dtype)


def flash_attention(qkv, batch, t, n_head, hd, mask=None):
    """qkv: (B*T, 3*D) bf16.  Returns attention output in (B*T, D) bf16."""
    bt, three_d = qkv.shape
    d = three_d // 3
    sm_scale = 1.0 / math.sqrt(hd)
    has_mask = mask is not None

    tq = _pick_tile(t, 256, 8, want_multi=True)
    # With a user mask we keep the mask block full-width in the key dim
    # (lane-legal block shape); without it, tile KV for the online softmax.
    tkv = t if has_mask else _pick_tile(t, 512, 8, want_multi=True)
    q_rows, kv_rows = t // tq, t // tkv

    kernel = functools.partial(_flash_attn_kernel, sm_scale=sm_scale,
                               tq=tq, tkv=tkv, has_mask=has_mask)

    in_specs = [
        pl.BlockSpec((tq, hd), lambda b, h, qi, ki: (b * q_rows + qi, h)),
        pl.BlockSpec((tkv, hd), lambda b, h, qi, ki: (b * kv_rows + ki, n_head + h)),
        pl.BlockSpec((tkv, hd), lambda b, h, qi, ki: (b * kv_rows + ki, 2 * n_head + h)),
    ]
    inputs = [qkv, qkv, qkv]
    if has_mask:
        in_specs.append(pl.BlockSpec((tq, tkv), lambda b, h, qi, ki: (qi, ki)))
        inputs.append(mask.astype(jnp.float32).reshape(t, t))

    return pl.pallas_call(
        kernel,
        out_shape=jax.ShapeDtypeStruct((bt, d), jnp.bfloat16),
        grid_spec=pltpu.PrefetchScalarGridSpec(
            num_scalar_prefetch=0,
            grid=(batch, n_head, t // tq, t // tkv),
            in_specs=in_specs,
            out_specs=pl.BlockSpec(
                (tq, hd), lambda b, h, qi, ki: (b * q_rows + qi, h)),
            scratch_shapes=[pltpu.VMEM((tq, 1), jnp.float32),
                            pltpu.VMEM((tq, 1), jnp.float32),
                            pltpu.VMEM((tq, hd), jnp.float32)],
        ),
        compiler_params=pltpu.CompilerParams(
            dimension_semantics=("parallel", "parallel", "parallel", "arbitrary"),
            vmem_limit_bytes=_VMEM_LIMIT),
    )(*inputs)


# ---------------------------------------------------------------------------
# kernel 3: K/N-tiled matmul + bias, fused LayerScale + residual add
# ---------------------------------------------------------------------------
def _proj_residual_kernel(h_ref, w_ref, b_ref, res_ref, scale_ref, o_ref, acc_ref):
    @pl.when(pl.program_id(2) == 0)
    def _():
        acc_ref[...] = jnp.zeros_like(acc_ref)

    acc_ref[...] += jnp.dot(h_ref[...], w_ref[...],
                            preferred_element_type=jnp.float32)

    @pl.when(pl.program_id(2) == pl.num_programs(2) - 1)
    def _():
        out = acc_ref[...] + b_ref[...].astype(jnp.float32)
        o_ref[...] = (res_ref[...].astype(jnp.float32)
                      + scale_ref[0] * out).astype(o_ref.dtype)


def proj_residual(h2d, w_bf16, wb, res2d, scale):
    m, kdim = h2d.shape
    n = w_bf16.shape[1]
    tm = _pick_tile(m, 256, 8, want_multi=True)
    tn = _pick_tile(n, 512, 128, want_multi=True)
    tk = _pick_tile(kdim, 512, 128, want_multi=False)
    return pl.pallas_call(
        _proj_residual_kernel,
        out_shape=jax.ShapeDtypeStruct((m, n), res2d.dtype),
        grid_spec=pltpu.PrefetchScalarGridSpec(
            num_scalar_prefetch=0,
            grid=(m // tm, n // tn, kdim // tk),
            in_specs=[
                pl.BlockSpec((tm, tk), lambda i, j, k: (i, k)),
                pl.BlockSpec((tk, tn), lambda i, j, k: (k, j)),
                pl.BlockSpec((1, tn), lambda i, j, k: (0, j)),
                pl.BlockSpec((tm, tn), lambda i, j, k: (i, j)),
                pl.BlockSpec(memory_space=pltpu.MemorySpace.SMEM),
            ],
            out_specs=pl.BlockSpec((tm, tn), lambda i, j, k: (i, j)),
            scratch_shapes=[pltpu.VMEM((tm, tn), jnp.float32)],
        ),
        compiler_params=pltpu.CompilerParams(
            dimension_semantics=("parallel", "parallel", "arbitrary"),
            vmem_limit_bytes=_VMEM_LIMIT),
    )(h2d, w_bf16, wb.reshape(1, n), res2d,
      jnp.asarray(scale, jnp.float32).reshape(1))


# ---------------------------------------------------------------------------
# Block forward (Pallas) and plain-JAX f32 reference
# ---------------------------------------------------------------------------
def block_forward(params, x, mask=None):
    b, t, d = x.shape
    nh = params["n_head"]
    hd = d // nh
    assert hd % 128 == 0, "head_dim must be a multiple of 128 (see TODO above)"
    xf = x.reshape(b * t, d)

    # bf16 copies of the weights (in a real model these live in HBM as bf16).
    w_qkv = params["w_qkv"].astype(jnp.bfloat16)
    w_attn_proj = params["w_attn_proj"].astype(jnp.bfloat16)
    w_fc = params["w_fc"].astype(jnp.bfloat16)
    w_mlp_proj = params["w_mlp_proj"].astype(jnp.bfloat16)

    # --- attention branch: x + scale_attn * attn(ln_1(x), mask) ---
    qkv = ln_matmul(xf, params["ln1_w"], params["ln1_b"], w_qkv, params["b_qkv"])
    att = flash_attention(qkv, b, t, nh, hd, mask=mask)        # (B*T, D) bf16
    x1 = proj_residual(att, w_attn_proj, params["b_attn_proj"],
                       xf, params["scale_attn"])                # f32 residual

    # --- MLP branch: x + scale_mlp * mlp(ln_2(x)) ---
    hid = ln_matmul(x1, params["ln2_w"], params["ln2_b"],
                    w_fc, params["b_fc"], apply_gelu=True)      # (B*T, 4D) bf16
    out = proj_residual(hid, w_mlp_proj, params["b_mlp_proj"],
                        x1, params["scale_mlp"])                # f32 residual
    return out.reshape(b, t, d)


def ref_block(params, x, mask=None):
    b, t, d = x.shape
    h = params["n_head"]
    hd = d // h
    sm_scale = 1.0 / math.sqrt(hd)

    def ln(z, w, bb):
        mu = jnp.mean(z, axis=-1, keepdims=True)
        var = jnp.mean((z - mu) ** 2, axis=-1, keepdims=True)
        return (z - mu) * jax.lax.rsqrt(var + _LN_EPS) * w + bb

    def attn(z):
        qkv = jnp.einsum("btd,dn->btn", z, params["w_qkv"],
                         precision=_HIGHEST) + params["b_qkv"]
        q, k, v = jnp.split(qkv, 3, axis=-1)

        def heads(u):
            return u.reshape(b, t, h, hd).transpose(0, 2, 1, 3)

        q, k, v = heads(q), heads(k), heads(v)
        s = jnp.einsum("bhqd,bhkd->bhqk", q, k, precision=_HIGHEST) * sm_scale
        causal = jnp.tril(jnp.ones((t, t), jnp.float32))
        allowed = causal if mask is None else causal * mask.reshape(t, t)
        s = jnp.where(allowed[None, None] > 0, s, _NEG_INF)
        p = jax.nn.softmax(s, axis=-1)
        o = jnp.einsum("bhqk,bhkd->bhqd", p, v, precision=_HIGHEST)
        o = o.transpose(0, 2, 1, 3).reshape(b, t, d)
        return jnp.einsum("btd,dn->btn", o, params["w_attn_proj"],
                          precision=_HIGHEST) + params["b_attn_proj"]

    def mlp(z):
        hid = jnp.einsum("btd,dn->btn", z, params["w_fc"],
                         precision=_HIGHEST) + params["b_fc"]
        hid = 0.5 * hid * (1.0 + jax.scipy.special.erf(hid / math.sqrt(2.0)))
        return jnp.einsum("btn,nd->btd", hid, params["w_mlp_proj"],
                          precision=_HIGHEST) + params["b_mlp_proj"]

    x = x + params["scale_attn"] * attn(ln(x, params["ln1_w"], params["ln1_b"]))
    x = x + params["scale_mlp"] * mlp(ln(x, params["ln2_w"], params["ln2_b"]))
    return x


def init_block_params(key, n_embd, n_head):
    ks = jax.random.split(key, 10)
    std = 0.02

    def w(k, shape):
        return std * jax.random.normal(k, shape, jnp.float32)

    return dict(
        n_head=n_head,
        ln1_w=1.0 + 0.1 * jax.random.normal(ks[0], (n_embd,), jnp.float32),
        ln1_b=0.1 * jax.random.normal(ks[1], (n_embd,), jnp.float32),
        ln2_w=1.0 + 0.1 * jax.random.normal(ks[2], (n_embd,), jnp.float32),
        ln2_b=0.1 * jax.random.normal(ks[3], (n_embd,), jnp.float32),
        w_qkv=w(ks[4], (n_embd, 3 * n_embd)),
        b_qkv=0.01 * jax.random.normal(ks[5], (3 * n_embd,), jnp.float32),
        w_attn_proj=w(ks[6], (n_embd, n_embd)),
        b_attn_proj=jnp.zeros((n_embd,), jnp.float32),
        w_fc=w(ks[7], (n_embd, 4 * n_embd)),
        b_fc=0.01 * jax.random.normal(ks[8], (4 * n_embd,), jnp.float32),
        w_mlp_proj=w(ks[9], (4 * n_embd, n_embd)),
        b_mlp_proj=jnp.zeros((n_embd,), jnp.float32),
        scale_attn=jnp.asarray(0.8, jnp.float32),   # LayerScale parameters
        scale_mlp=jnp.asarray(1.2, jnp.float32),
    )


if __name__ == "__main__":
    key = jax.random.PRNGKey(0)
    # head_dim = 128 so head slices of qkv are lane-aligned; T=32 exercises
    # the q/kv tiling, online softmax and causal block skipping.
    B, T, N_EMBD, N_HEAD = 2, 32, 256, 2

    k_x, k_p = jax.random.split(key)
    params = init_block_params(k_p, N_EMBD, N_HEAD)
    x = jax.random.normal(k_x, (B, T, N_EMBD), jnp.float32)

    # mask=None path (pure causal)
    out = jax.block_until_ready(block_forward(params, x, mask=None))
    ref = ref_block(params, x, mask=None)
    assert out.shape == x.shape and out.dtype == x.dtype
    err = float(jnp.max(jnp.abs(out - ref)))
    assert err < 3e-2, f"mask=None max_err={err}"

    # user-mask path (padding-style mask blocking the last 8 key positions)
    col = jnp.arange(T)
    user_mask = (jnp.tile(col[None, :], (T, 1)) < T - 8).astype(jnp.float32)
    out_m = jax.block_until_ready(block_forward(params, x, mask=user_mask))
    ref_m = ref_block(params, x, mask=user_mask)
    err_m = float(jnp.max(jnp.abs(out_m - ref_m)))
    assert err_m < 3e-2, f"mask max_err={err_m}"

    print("KERNEL_OK")
</pallas_src>

<mosaic_0001>
module attributes {stable_mosaic.version = 11 : i64} {
  func.func @_ln_matmul_kernel(%arg0: i32, %arg1: i32, %arg2: memref<32x256xf32, #tpu.memory_space<vmem>>, %arg3: memref<1x256xf32, #tpu.memory_space<vmem>>, %arg4: memref<1x256xf32, #tpu.memory_space<vmem>>, %arg5: memref<256x384xbf16, #tpu.memory_space<vmem>>, %arg6: memref<1x384xf32, #tpu.memory_space<vmem>>, %arg7: memref<32x384xbf16, #tpu.memory_space<vmem>>) attributes {dimension_semantics = [#tpu.dimension_semantics<parallel>, #tpu.dimension_semantics<parallel>], iteration_bounds = array<i64: 2, 2>, scalar_prefetch = 0 : i64, scratch_operands = 0 : i64, tpu.core_type = #tpu.core_type<tc>, window_params = [{transform_indices = @transform_0, window_bounds = array<i64: 32, 256>}, {pipeline_mode = #tpu.pipeline_mode<synchronous>, transform_indices = @transform_1, window_bounds = array<i64: 1, 256>}, {pipeline_mode = #tpu.pipeline_mode<synchronous>, transform_indices = @transform_2, window_bounds = array<i64: 1, 256>}, {transform_indices = @transform_3, window_bounds = array<i64: 256, 384>}, {transform_indices = @transform_4, window_bounds = array<i64: 1, 384>}, {transform_indices = @transform_5, window_bounds = array<i64: 32, 384>}]} {
    %c0 = arith.constant 0 : index
    %c0_0 = arith.constant 0 : index
    %0 = vector.load %arg2[%c0, %c0_0] : memref<32x256xf32, #tpu.memory_space<vmem>>, vector<32x256xf32>
    %cst = arith.constant dense<0.000000e+00> : vector<32xf32>
    %1 = vector.multi_reduction <add>, %0, %cst [1] : vector<32x256xf32> to vector<32xf32>
    %2 = vector.shape_cast %1 : vector<32xf32> to vector<32x1xf32>
    %cst_1 = arith.constant 2.560000e+02 : f32
    %3 = vector.broadcast %cst_1 : f32 to vector<32x1xf32>
    %4 = arith.divf %2, %3 : vector<32x1xf32>
    %5 = vector.broadcast %4 : vector<32x1xf32> to vector<32x256xf32>
    %6 = arith.subf %0, %5 : vector<32x256xf32>
    %7 = arith.mulf %6, %6 : vector<32x256xf32>
    %cst_2 = arith.constant dense<0.000000e+00> : vector<32xf32>
    %8 = vector.multi_reduction <add>, %7, %cst_2 [1] : vector<32x256xf32> to vector<32xf32>
    %9 = vector.shape_cast %8 : vector<32xf32> to vector<32x1xf32>
    %cst_3 = arith.constant 2.560000e+02 : f32
    %10 = vector.broadcast %cst_3 : f32 to vector<32x1xf32>
    %11 = arith.divf %9, %10 : vector<32x1xf32>
    %cst_4 = arith.constant 9.99999974E-6 : f32
    %12 = vector.broadcast %cst_4 : f32 to vector<32x1xf32>
    %13 = arith.addf %11, %12 : vector<32x1xf32>
    %14 = math.rsqrt %13 : vector<32x1xf32>
    %15 = vector.broadcast %14 : vector<32x1xf32> to vector<32x256xf32>
    %16 = arith.mulf %6, %15 : vector<32x256xf32>
    %c0_5 = arith.constant 0 : index
    %c0_6 = arith.constant 0 : index
    %17 = vector.load %arg3[%c0_5, %c0_6] : memref<1x256xf32, #tpu.memory_space<vmem>>, vector<1x256xf32>
    %18 = vector.broadcast %17 : vector<1x256xf32> to vector<32x256xf32>
    %19 = arith.mulf %16, %18 : vector<32x256xf32>
    %c0_7 = arith.constant 0 : index
    %c0_8 = arith.constant 0 : index
    %20 = vector.load %arg4[%c0_7, %c0_8] : memref<1x256xf32, #tpu.memory_space<vmem>>, vector<1x256xf32>
    %21 = vector.broadcast %20 : vector<1x256xf32> to vector<32x256xf32>
    %22 = arith.addf %19, %21 : vector<32x256xf32>
    %23 = arith.truncf %22 : vector<32x256xf32> to vector<32x256xbf16>
    %c0_9 = arith.constant 0 : index
    %c0_10 = arith.constant 0 : index
    %24 = vector.load %arg5[%c0_9, %c0_10] : memref<256x384xbf16, #tpu.memory_space<vmem>>, vector<256x384xbf16>
    %cst_11 = arith.constant dense<0.000000e+00> : vector<32x384xf32>
    %25 = tpu.matmul %23, %24, %cst_11 {dimension_numbers = #tpu.dot_dimension_numbers<[1], [0], [0], [1], [0, 0, 1, 1], [], []>} : vector<32x256xbf16>, vector<256x384xbf16>, vector<32x384xf32> -> vector<32x384xf32>
    %c0_12 = arith.constant 0 : index
    %c0_13 = arith.constant 0 : index
    %26 = vector.load %arg6[%c0_12, %c0_13] : memref<1x384xf32, #tpu.memory_space<vmem>>, vector<1x384xf32>
    %27 = vector.broadcast %26 : vector<1x384xf32> to vector<32x384xf32>
    %28 = arith.addf %25, %27 : vector<32x384xf32>
    %29 = arith.truncf %28 : vector<32x384xf32> to vector<32x384xbf16>
    %c0_14 = arith.constant 0 : index
    %c0_15 = arith.constant 0 : index
    %30 = vector.load %arg7[%c0_14, %c0_15] : memref<32x384xbf16, #tpu.memory_space<vmem>>, vector<32x384xbf16>
    tpu.vector_store %arg7[%c0_14, %c0_15], %29 {strides = array<i32>} : memref<32x384xbf16, #tpu.memory_space<vmem>>, vector<32x384xbf16>,
    return
  }
  func.func @transform_0(%arg0: i32, %arg1: i32) -> (i32, i32) {
    %c0_i32 = arith.constant 0 : i32
    %c0_i32_0 = arith.constant 0 : i32
    return %arg0, %c0_i32 : i32, i32
  }
  func.func @transform_1(%arg0: i32, %arg1: i32) -> (i32, i32) {
    %c0_i32 = arith.constant 0 : i32
    %c0_i32_0 = arith.constant 0 : i32
    %c0_i32_1 = arith.constant 0 : i32
    return %c0_i32, %c0_i32_0 : i32, i32
  }
  func.func @transform_2(%arg0: i32, %arg1: i32) -> (i32, i32) {
    %c0_i32 = arith.constant 0 : i32
    %c0_i32_0 = arith.constant 0 : i32
    %c0_i32_1 = arith.constant 0 : i32
    return %c0_i32, %c0_i32_0 : i32, i32
  }
  func.func @transform_3(%arg0: i32, %arg1: i32) -> (i32, i32) {
    %c0_i32 = arith.constant 0 : i32
    %c0_i32_0 = arith.constant 0 : i32
    return %c0_i32, %arg1 : i32, i32
  }
  func.func @transform_4(%arg0: i32, %arg1: i32) -> (i32, i32) {
    %c0_i32 = arith.constant 0 : i32
    %c0_i32_0 = arith.constant 0 : i32
    return %c0_i32, %arg1 : i32, i32
  }
  func.func @transform_5(%arg0: i32, %arg1: i32) -> (i32, i32) {
    %c0_i32 = arith.constant 0 : i32
    return %arg0, %arg1 : i32, i32
  }
}

</mosaic_0001>

<bundles_post_ra>
// kernel: tpu_custom_call.1
= control target key start
LH: loop header
LB: loop body
LE: loop exit
PB: predicated region body
PF: predicated region fallthrough
CT: control target
= control target key end

     0   :  { %s2121_s0 = inlined_call_operand.hbm [shape: f32[64,256], index: 0, kind: input, shape index: {}]   ;;  %s2122_s1 = inlined_call_operand.vmem [shape: f32[1,256], index: 1, kind: input, shape index: {}]   ;;  %s2123_s2 = inlined_call_operand.vmem [shape: f32[1,256], index: 2, kind: input, shape index: {}]   ;;  %s2124_s3 = inlined_call_operand.hbm [shape: bf16[256,768], index: 3, kind: input, shape index: {}]   ;;  %s2125_s4 = inlined_call_operand.vmem [shape: f32[1,768], index: 4, kind: input, shape index: {}]   ;;  %s2126_s5 = inlined_call_operand.hbm [shape: bf16[64,768], index: 5, kind: output, shape index: {}]  }
   0x1   :  { %2137 = sst [smem:[#allocation17_spill]] %s2121_s0 }
   0x2   :  { %2138 = sst [smem:[#allocation18_spill]] %s2123_s2 }
   0x3   :  { %2139 = sst [smem:[#allocation19_spill]] %s2125_s4 }
   0x4   :  { %2140 = sst [smem:[#allocation20_spill]] %s2126_s5 }
   0x5   :  { %10 = vsyncpa [#allocation3], 0 }
   0x6   :  { %12 = vsyncpa [#allocation3 + $0x1], 0 }
   0x7   :  { %13 = vsyncpa [#allocation6], 0 }
   0x8   :  { %15 = vsyncpa [#allocation6 + $0x1], 0 }
   0x9   :  { %16 = vsyncpa [#allocation4], 0 }
   0xa   :  { %18 = vsyncpa [#allocation4 + $0x1], 0  ;;  %s1641_s18 = smov 0   ;;  %s1643_s19 = smov 0  }
   0xb   :  { %s1645_s20 = smov 0   ;;  %s1647_s21 = smov 0  }
   0xc   :  { %s1649_s22 = smov 0   ;;  %s1651_s23 = smov 0  }
   0xd   :  { %s1653_s24 = smov 0   ;;  %s1655_s25 = smov 0  }
   0xe   :  { %s1657_s26 = smov 0   ;;  %s1659_s27 = smov 0  }
   0xf   :  { %s1661_s28 = smov 0   ;;  %s1663_s29 = smov 0  }
  0x10   :  { %s1665_s30 = smov 0   ;;  %s1667_s6 = smov 0  }
  0x11 LB: > { %2141 = sst [smem:[#allocation11_spill]] %s1582_s27  ;;  %s1062_s7 = sadd.s32 4294967295, %s1598_s6   ;;  %s1598_s6 = sphi %s1667_s6, %s24_s6   ;;  %s1594_s30 = sphi %s1665_s30, %s2176_s30   ;;  %s1590_s29 = sphi %s1663_s29, %s2188_s29   ;;  %s1586_s28 = sphi %s1661_s28, %s2187_s28   ;;  %s1582_s27 = sphi %s1659_s27, %s2173_s27   ;;  %s1578_s26 = sphi %s1657_s26, %s2186_s26   ;;  %s1574_s25 = sphi %s1655_s25, %s2185_s25   ;;  %s1570_s24 = sphi %s1653_s24, %s2184_s24   ;;  %s1566_s23 = sphi %s1651_s23, %s2183_s23   ;;  %s1562_s22 = sphi %s1649_s22, %s2182_s22   ;;  %s1558_s21 = sphi %s1647_s21, %s2181_s21   ;;  %s1554_s20 = sphi %s1645_s20, %s2180_s20   ;;  %s1550_s19 = sphi %s1643_s19, %s2179_s19   ;;  %s1546_s18 = sphi %s1641_s18, %s2178_s18  }
  0x12   : > { %2142 = sst [smem:[#allocation12_spill]] %s1586_s28  ;;  %p50_p0 = scmp.ne.s32.totalorder %s1578_s26, %s1574_s25 }
  0x13   : > { %2143 = sst [smem:[#allocation13_spill]] %s1590_s29  ;;  %p2129_p1 = scmp.eq.s32.totalorder %s1598_s6, 0 }
  0x14   : > { %2144 = sst [smem:[#allocation14_spill]] %s1594_s30  ;;  %p56_p2 = scmp.ne.s32.totalorder %s1574_s25, %s1570_s24 }
  0x15   : > { %p1716_p3 = scmp.eq.s32.totalorder %s1062_s7, 0  ;;  %p1720_p4 = scmp.eq.s32.totalorder %s1062_s7, 3 }
  0x16   : > { %p52_p5 = por %p2129_p1, %p50_p0  ;;  %p2128_p7 = scmp.lt.s32.totalorder %s1598_s6, 4 }
  0x17   : > { %s2146_s11 = scalar_select %p1720_p4, 1, 0 }
  0x18   : > { %p1728_p6 = por %p1716_p3, %p56_p2  ;;  %s208_s13 = sand.u32 1, %s1578_s26  }
  0x19   : > { %s1135_s14 = sshll.u32 %s1594_s30, 10  ;;  %s1066_s15 = sshll.u32 %s208_s13, 6 }
  0x1a   : > { %s2147_s12 = scalar_select %p1728_p6, 1, 0 }
  0x1b   : > { %s2148_s0 = sld [smem:[#allocation17_spill]]  ;;  %s212_s7 = scalar_lea.vmem [#allocation2], %s1066_s15 }
  0x1c   : > { %s220_s9 = sshll.u32 %s212_s7, 4  ;;  %p1742_p8 = pnand %p2128_p7, %p52_p5  ;;  %s1746_s9 = int_to_ptr.vmem [resolvable:$true] %s220_s9 }
  0x1d   : > { %s1748_s5 = scalar_lea.sflag [#allocation3], %s208_s13 }
  0x1e   : > { %p1390_p10 = pneg %p1742_p8 }
  0x21   : > { %s1738_s24 = scalar_lea.hbm %s2148_s0, %s1135_s14  ;;  %s1393_s17 = scalar_lea.hbm %s2148_s0, 2048 }
  0x22   : > { %s1388_s16 = scalar_lea.hbm %s1738_s24, 1024  ;;  %p1394_p13 = scmp.lt.u32.totalorder %s1738_s24, %s2148_s0 }
  0x23   : > { %p1389_p9 = scmp.ne.s32.totalorder %s1738_s24, %s1388_s16  ;;  %p1395_p0 = scmp.lt.u32.totalorder %s1393_s17, %s1388_s16 }
  0x24   : > { %p1397_p5 = scmp.lt.u32.totalorder %s1388_s16, %s1738_s24 }
  0x25   : > { %p1391_p11 = pnand %p1390_p10, %p1389_p9  ;;  %p1396_p2 = por %p1395_p0, %p1394_p13 }
  0x27   : > { %p1392_p12 = pneg %p1391_p11  ;;  %p1398_p7 = por %p1397_p5, %p1396_p2 }
  0x29   : > { %p1399_p1 = pnand %p1398_p7, %p1392_p12 }
  0x2b   : > { %1402 = shalt.err (!%p1399_p1)
}
  0x2c   : > { %s1403_s13 = scalar_lea.vmem %s1746_s9, 1024  ;;  %s1600_s14 = smov [#allocation2]  }
  0x2d   : > { %p1404_p9 = scmp.ne.s32.totalorder %s1746_s9, %s1403_s13  ;;  %s1408_s15 = sshll.u32 %s1600_s14, 4  ;;  %s1409_s15 = int_to_ptr.vmem [resolvable:$false] %s1408_s15 }
  0x2e   : > { %s1410_s28 = scalar_lea.vmem %s1409_s15, 2048  ;;  %p1411_p4 = scmp.lt.s32.totalorder %s1746_s9, %s1409_s15 }
  0x2f   : > { %p1406_p11 = pnand %p1404_p9, %p1390_p10  ;;  %p1412_p13 = scmp.lt.s32.totalorder %s1410_s28, %s1403_s13 }
  0x31   : > { %p1407_p6 = pneg %p1406_p11  ;;  %p1413_p0 = por %p1412_p13, %p1411_p4 }
  0x33   : > { %p1414_p2 = pnand %p1413_p0, %p1407_p6 }
  0x35   : > { %1417 = shalt.err (!%p1414_p2)
}
  0x36   : > { %s1601_s16 = smov 256   ;;  %s1602_s17 = smov 16  }
  0x37   : > { %1186 = dma.hbm_to_vmem [thread:$0]  (!%p1742_p8), %s1738_s24, 1024, %s1746_s9, %s1748_s5, %s1601_s16, %s1601_s16, %s1602_s17  }
  0x38   : > { %p1071_p1 = scmp.ge.s32.totalorder %s1598_s6, 1  ;;  %p257_p4 = scmp.lt.s32.totalorder %s1598_s6, 5 }
  0x39   : > { %s1063_s13 = sadd.s32 4294967294, %s1598_s6   ;;  %s33_s14 = sadd.s32 1, %s1590_s29 }
  0x3a   : > { %p1778_p6 = pnand %p1071_p1, %p257_p4  ;;  %s111_s15 = sadd.s32 1, %s1566_s23 }
  0x3b   : > { %p34_p7 = scmp.ge.s32.totalorder %s33_s14, 2  ;;  %p118_p10 = scmp.ne.s32.totalorder %s1566_s23, %s1562_s22 }
  0x3c   : > { %p124_p12 = scmp.ne.s32.totalorder %s1562_s22, %s1558_s21  ;;  %s165_s8 = sadd.s32 1, %s1554_s20 }
  0x3d   : > { %s2190_s14 = smov (%p34_p7, %s33_s14), 0  ;;  %s2152_s5 = sadd.s32 1, %s1594_s30 }
  0x3e   : > { %2151 = sst [smem:[#allocation15_spill]] %s2190_s14  ;;  %s2192_s5 = smov (!%p34_p7, %s2152_s5), %s1594_s30 }
  0x3f   : > { %s108_s9 = ssub.s32 %s1590_s29, %s2190_s14  ;;  %p2153_p8 = scmp.eq.s32.totalorder %s1598_s6, 0 }
  0x40   : > { %p38_p9 = scmp.ge.s32.totalorder %s2192_s5, 2  ;;  %p109_p11 = scmp.eq.s32.totalorder %s108_s9, 0 }
  0x41   : > { %p1799_p5 = por %p118_p10, %p2153_p8  ;;  %p1805_p13 = por %p124_p12, %p1716_p3 }
  0x42   : > { %p175_p0 = scmp.ne.s32.totalorder %s1554_s20, %s1550_s19  ;;  %s2194_s5 = smov (%p38_p9, %s2192_s5), 0 }
  0x43   : > { %s2155_s21 = scalar_select %p1805_p13, 1, 0 }
  0x44   : > { %2156 = sst [smem:[#allocation16_spill]] %s2194_s5  ;;  %s40_s16 = ssub.s32 %s1594_s30, %s2194_s5 }
  0x45   : > { %s1814_s28 = scalar_select %p109_p11, %s1566_s23, %s111_s15  }
  0x46   : > { %p2157_p2 = scmp.ne.s32.totalorder %s2146_s11, 0  ;;  %p41_p4 = scmp.eq.s32.totalorder %s40_s16, 0 }
  0x47   : > { %s162_s10 = sor.u32 %s108_s9, %s40_s16  ;;  %p181_p7 = scmp.ne.s32.totalorder %s1550_s19, %s1546_s18 }
  0x48   : > { %p1820_p1 = por %p2157_p2, %p175_p0  ;;  %p163_p3 = scmp.eq.s32.totalorder %s162_s10, 0 }
  0x49   : > { %s2159_s0 = sadd.s32 1, %s1578_s26  ;;  %p182_p10 = scmp.eq.s32.totalorder %s1063_s13, 3 }
  0x4a   : > { %s2158_s17 = scalar_select %p1820_p1, 1, 0 }
  0x4b   : > { %s1829_s14 = scalar_select %p41_p4, %s1578_s26, %s2159_s0  }
  0x4c   : > { %s1832_s4 = scalar_select %p163_p3, %s1554_s20, %s165_s8  }
  0x4d   : > { %s230_s27 = sand.u32 1, %s1566_s23   ;;  %p1835_p12 = por %p182_p10, %p181_p7 }
  0x4e   : > { %s1173_s2 = smul.u32 384, %s230_s27  ;;  %p2161_p8 = scmp.lt.s32.totalorder %s1598_s6, 4 }
  0x4f   : > { %s2160_s15 = scalar_select %p1835_p12, 1, 0 }
  0x50   : > { %s1136_s11 = smul.u32 192, %s1590_s29  ;;  %p1844_p9 = pnand %p2161_p8, %p1799_p5 }
  0x51   : > { %s234_s13 = scalar_lea.vmem [#allocation5], %s1173_s2  ;;  %s1855_s24 = scalar_lea.sflag [#allocation6], %s230_s27 }
  0x52   : > { %s1851_s0 = scalar_lea.hbm %s2124_s3, %s1136_s11  ;;  %s241_s8 = sshll.u32 %s234_s13, 4  ;;  %s1853_s8 = int_to_ptr.vmem [resolvable:$true] %s241_s8 }
  0x53   : > { %s1418_s10 = scalar_lea.hbm %s1851_s0, 6144  ;;  %p1420_p11 = pneg %p1844_p9 }
  0x54   : > { %p1419_p5 = scmp.ne.s32.totalorder %s1851_s0, %s1418_s10  ;;  %s1423_s16 = scalar_lea.hbm %s2124_s3, 12288 }
  0x55   : > { %p1424_p4 = scmp.lt.u32.totalorder %s1851_s0, %s2124_s3  ;;  %p1425_p3 = scmp.lt.u32.totalorder %s1423_s16, %s1418_s10 }
  0x56   : > { %p1421_p0 = pnand %p1420_p11, %p1419_p5  ;;  %p1427_p10 = scmp.lt.u32.totalorder %s1418_s10, %s1851_s0 }
  0x57   : > { %p1426_p7 = por %p1425_p3, %p1424_p4 }
  0x58   : > { %p1422_p2 = pneg %p1421_p0 }
  0x59   : > { %p1428_p8 = por %p1427_p10, %p1426_p7 }
  0x5b   : > { %p1429_p12 = pnand %p1428_p8, %p1422_p2 }
  0x5d   : > { %1432 = shalt.err (!%p1429_p12)
}
  0x5e   : > { %s1433_s2 = scalar_lea.vmem %s1853_s8, 6144  ;;  %s1603_s27 = smov [#allocation5]  }
  0x5f   : > { %p1434_p5 = scmp.ne.s32.totalorder %s1853_s8, %s1433_s2  ;;  %s1438_s13 = sshll.u32 %s1603_s27, 4  ;;  %s1439_s13 = int_to_ptr.vmem [resolvable:$false] %s1438_s13 }
  0x60   : > { %s1440_s29 = scalar_lea.vmem %s1439_s13, 12288  ;;  %p1441_p13 = scmp.lt.s32.totalorder %s1853_s8, %s1439_s13 }
  0x61   : > { %p1436_p0 = pnand %p1434_p5, %p1420_p11  ;;  %p1442_p4 = scmp.lt.s32.totalorder %s1440_s29, %s1433_s2 }
  0x63   : > { %p1437_p1 = pneg %p1436_p0  ;;  %p1443_p3 = por %p1442_p4, %p1441_p13 }
  0x65   : > { %p1444_p7 = pnand %p1443_p3, %p1437_p1 }
  0x67   : > { %1447 = shalt.err (!%p1444_p7)
}
  0x68   : > { %s1604_s30 = smov 384   ;;  %s1605_s10 = smov 192  }
  0x69   : > { %s1606_s11 = smov 12   ;;  %261 = sbr.rel (%p1778_p6) target bundleno = 686 (0x2ae), region = 40 }
  0x6a   : > { %1189 = dma.hbm_to_vmem [thread:$0]  (!%p1844_p9), %s1851_s0, 6144, %s1853_s8, %s1855_s24, %s1604_s30, %s1605_s10, %s1606_s11  }
  0x6b   : > { %s263_s9 = sand.u32 (!%p1778_p6), 1, %s1574_s25   ;;  %p2163_p13 = scmp.ne.s32.totalorder (!%p1778_p6), %s2147_s12, 0 }
  0x6c   : > { %s1072_s16 = sshll.u32 (!%p1778_p6), %s263_s9, 6  ;;  %s264_s2 = scalar_lea.sflag (!%p1778_p6), [#allocation3], %s263_s9 }
  0x6d   : > { %s267_s27 = scalar_lea.vmem (!%p1778_p6), [#allocation2], %s1072_s16 }
  0x70   : > { %1533 = dma.done.wait (%p2163_p13), %s264_s2, 1024  }
  0x71   : > { %1535 = vsyncadd (%p2163_p13), %s264_s2, 4294966272  ;;  %s272_s13 = sand.u32 1, %s1562_s22   ;;  %p2164_p1 = scmp.ne.s32.totalorder %s2155_s21, 0 }
  0x72   : > { %s1174_s29 = smul.u32 384, %s272_s13  ;;  %s273_s5 = scalar_lea.sflag [#allocation6], %s272_s13 }
  0x74   : > { %s1891_s0 = scalar_lea.vmem [#allocation5], %s1174_s29 }
  0x75   : > { %1537 = dma.done.wait (%p2164_p1), %s273_s5, 6144  }
  0x76   : > { %1539 = vsyncadd (%p2164_p1), %s273_s5, 4294961152  ;;  %v322_v0 = vld [vmem:[%s267_s27] sm:$0xff]  ;;  %v323_v1 = vld [vmem:[%s267_s27 + $0x8] sm:$0xff]  ;;  %s2165_s24 = sld [smem:[#allocation18_spill]]  ;;  %s2166_s30 = sld [smem:[#allocation11_spill]] }
  0x77   : > { %v326_v2 = vld [vmem:[%s267_s27 + $0x20] sm:$0xff]  ;;  %v330_v3 = vadd.f32 %v323_v1, %v322_v0  ;;  %v327_v4 = vld [vmem:[%s267_s27 + $0x28] sm:$0xff]  ;;  %v1897_v5 = vld [vmem:[%s267_s27 + $0x10] sm:$0xff]  ;;  %s2167_s2 = sld [smem:[#allocation19_spill]]  ;;  %s309_s13 = sand.u32 1, %s1550_s19  }
  0x78   : > { %v1899_v6 = vld [vmem:[%s267_s27 + $0x18] sm:$0xff]  ;;  %v336_v7 = vadd.f32 %v327_v4, %v326_v2  ;;  %v1901_v8 = vld [vmem:[%s267_s27 + $0x30] sm:$0xff]  ;;  %v1318_v13 = vld [vmem:[%s1891_s0] ss:$12 sps:$4 sm:$0xff]   ;;  %s2168_s29 = sld [smem:[#allocation12_spill]]  ;;  %s1175_s5 = smul.u32 48, %s309_s13 }
  0x79   : > { %v1903_v9 = vld [vmem:[%s267_s27 + $0x38] sm:$0xff]  ;;  %331 = vadd.xlane.f32.xlu0 %v330_v3  ;;  %v333_v10 = vadd.f32 %v1899_v6, %v1897_v5  ;;  %v1316_v12 = vld [vmem:[%s1891_s0 + $0x4] ss:$12 sps:$4 sm:$0xff]   ;;  %v1322_v16 = vld [vmem:[%s1891_s0 + $0x34] ss:$12 sps:$4 sm:$0xff]   ;;  %s2045_s9 = scalar_lea.sflag [#allocation4], %s309_s13 }
  0x7a   : > { %337 = vadd.xlane.f32.xlu1 %v336_v7  ;;  %v339_v11 = vadd.f32 %v1903_v9, %v1901_v8  ;;  %v1319_v14 = vld [vmem:[%s1891_s0 + $0x1c] ss:$12 sps:$4 sm:$0xff]   ;;  %776 = vmatprep.subr.bf16.mxu0 %v1316_v12  ;;  %v1321_v15 = vld [vmem:[%s1891_s0 + $0x18] ss:$12 sps:$4 sm:$0xff]   ;;  %v1330_v23 = vld [vmem:[%s1891_s0 + $0x60] ss:$12 sps:$4 sm:$0xff]  }
  0x7b   : > { %777 = vmatpush1.bf16.msra.mxu0 %v1318_v13  ;;  %v1342_v17 = vld [vmem:[%s1891_s0 + $0xc8] ss:$12 sps:$4 sm:$0xff]   ;;  %v1324_v19 = vld [vmem:[%s1891_s0 + $0x30] ss:$12 sps:$4 sm:$0xff]   ;;  %v1325_v20 = vld [vmem:[%s1891_s0 + $0x4c] ss:$12 sps:$4 sm:$0xff]  }
  0x7c   : > { %778 = vmatprep.subr.bf16.mxu0 %v1319_v14  ;;  %v1344_v18 = vld [vmem:[%s1891_s0 + $0x8] ss:$12 sps:$4 sm:$0xff]   ;;  %1145 = vmatprep.subr.bf16.mxu1 %v1342_v17  ;;  %v1328_v22 = vld [vmem:[%s1891_s0 + $0x64] ss:$12 sps:$4 sm:$0xff]   ;;  %v1337_v28 = vld [vmem:[%s1891_s0 + $0xac] ss:$12 sps:$4 sm:$0xff]  }
  0x7d   : > { %334 = vadd.xlane.f32.xlu0 %v333_v10  ;;  %1146 = vmatpush3.bf16.msra.mxu1 %v1344_v18  ;;  %v1327_v21 = vld [vmem:[%s1891_s0 + $0x48] ss:$12 sps:$4 sm:$0xff]   ;;  %v1333_v25 = vld [vmem:[%s1891_s0 + $0x78] ss:$12 sps:$4 sm:$0xff]   ;;  %v1336_v27 = vld [vmem:[%s1891_s0 + $0x90] ss:$12 sps:$4 sm:$0xff]  }
  0x7e   : > { %340 = vadd.xlane.f32.xlu1 %v339_v11  ;;  %v1331_v24 = vld [vmem:[%s1891_s0 + $0x7c] ss:$12 sps:$4 sm:$0xff]   ;;  %v1334_v26 = vld [vmem:[%s1891_s0 + $0x94] ss:$12 sps:$4 sm:$0xff]   ;;  %v1340_v30 = vld [vmem:[%s1891_s0 + $0xc4] ss:$12 sps:$4 sm:$0xff]  }
  0x7f   : > { %779 = vmatpush1.bf16.msra.mxu0 %v1321_v15  ;;  %v1339_v29 = vld [vmem:[%s1891_s0 + $0xa8] ss:$12 sps:$4 sm:$0xff]   ;;  %v1343_v31 = vld [vmem:[%s1891_s0 + $0xc0] ss:$12 sps:$4 sm:$0xff]   ;;  %v1348_v62 = vld [vmem:[%s1891_s0 + $0xd8] ss:$12 sps:$4 sm:$0xff]  }
  0x80   : > { %780 = vmatprep.subr.bf16.mxu0 %v1322_v16  ;;  %v1345_v60 = vld [vmem:[%s1891_s0 + $0xdc] ss:$12 sps:$4 sm:$0xff]   ;;  %v1347_v61 = vld [vmem:[%s1891_s0 + $0xe0] ss:$12 sps:$4 sm:$0xff]   ;;  %v1354_v3 = vld [vmem:[%s1891_s0 + $0x38] ss:$12 sps:$4 sm:$0xff]  }
  0x81   : > { %v1349_v63 = vld [vmem:[%s1891_s0 + $0x20] ss:$12 sps:$4 sm:$0xff]   ;;  %1147 = vmatprep.subr.bf16.mxu1 %v1347_v61  ;;  %v1359_v7 = vld [vmem:[%s1891_s0 + $0x50] ss:$12 sps:$4 sm:$0xff]   ;;  %v1364_v11 = vld [vmem:[%s1891_s0 + $0x68] ss:$12 sps:$4 sm:$0xff]  }
  0x82   : > { %1148 = vmatpush3.bf16.msra.mxu1 %v1349_v63  ;;  %v1363_v10 = vld [vmem:[%s1891_s0 + $0x120] ss:$12 sps:$4 sm:$0xff]   ;;  %v1365_v12 = vld [vmem:[%s1891_s0 + $0x13c] ss:$12 sps:$4 sm:$0xff]   ;;  %v1368_v14 = vld [vmem:[%s1891_s0 + $0x138] ss:$12 sps:$4 sm:$0xff]  }
  0x83   : > { %781 = vmatpush1.bf16.msra.mxu0 %v1324_v19  ;;  %v1367_v13 = vld [vmem:[%s1891_s0 + $0x140] ss:$12 sps:$4 sm:$0xff]   ;;  %v1372_v17 = vld [vmem:[%s1891_s0 + $0x158] ss:$12 sps:$4 sm:$0xff]   ;;  %v1373_v18 = vld [vmem:[%s1891_s0 + $0x150] ss:$12 sps:$4 sm:$0xff]  }
  0x84   : > { %782 = vmatprep.subr.bf16.mxu0 %v1325_v20  ;;  %v1369_v15 = vld [vmem:[%s1891_s0 + $0x80] ss:$12 sps:$4 sm:$0xff]   ;;  %v1374_v19 = vld [vmem:[%s1891_s0 + $0x98] ss:$12 sps:$4 sm:$0xff]   ;;  %s2012_s10 = smul.u32 3, %s2166_s30  ;;  %s2024_s12 = scalar_lea.vmem [#allocation7], %s1175_s5 }
  0x85   : > { %v1370_v16 = vld [vmem:[%s1891_s0 + $0x154] ss:$12 sps:$4 sm:$0xff]   ;;  %v1375_v20 = vld [vmem:[%s1891_s0 + $0x16c] ss:$12 sps:$4 sm:$0xff]   ;;  %s943_s8 = sshll.u32 %s2024_s12, 4  ;;  %p2170_p9 = scmp.ne.s32.totalorder %s2158_s17, 0  ;;  %s2038_s8 = int_to_ptr.vmem [resolvable:$true] %s943_s8 }
  0x86   : > { %p315_p6 = scmp.lt.s32.totalorder %s2012_s10, 5  ;;  %s1448_s16 = scalar_lea.vmem %s2038_s8, 768 }
  0x87   : > { %783 = vmatpush1.bf16.msra.mxu0 %v1327_v21  ;;  %v1377_v21 = vld [vmem:[%s1891_s0 + $0x170] ss:$12 sps:$4 sm:$0xff]   ;;  %p1449_p12 = scmp.ne.s32.totalorder %s2038_s8, %s1448_s16 }
  0x88   : > { %784 = vmatprep.subr.bf16.mxu0 %v1328_v22  ;;  %v1378_v22 = vld [vmem:[%s1891_s0 + $0x168] ss:$12 sps:$4 sm:$0xff]   ;;  %s316_s11 = scalar_select %p315_p6, %s2012_s10, 5 }
  0x89   : > { %p1450_p11 = pnand %p1449_p12, %p2170_p9 }
  0x8a   : > { %s317_s27 = scalar_lea.vmem %s2167_s2, %s316_s11  ;;  %s1607_s2 = smov [#allocation7]  }
  0x8b   : > { %785 = vmatpush1.bf16.msra.mxu0 %v1330_v23  ;;  %v1379_v23 = vld [vmem:[%s1891_s0 + $0xb0] ss:$12 sps:$4 sm:$0xff]   ;;  %p1451_p2 = pneg %p1450_p11 }
  0x8c   : > { %786 = vmatprep.subr.bf16.mxu0 %v1331_v24 }
  0x8f   : > { %787 = vmatpush1.bf16.msra.mxu0 %v1333_v25 }
  0x90   : > { %788 = vmatprep.subr.bf16.mxu0 %v1334_v26 }
  0x93   : > { %789 = vmatpush1.bf16.msra.mxu0 %v1336_v27  ;;  %v397_v27 = vlaneseq }
  0x94   : > { %790 = vmatprep.subr.bf16.mxu0 %v1337_v28 }
  0x97   : > { %791 = vmatpush1.bf16.msra.mxu0 %v1339_v29 }
  0x98   : > { %792 = vmatprep.subr.bf16.mxu0 %v1340_v30 }
  0x9b   : > { %793 = vmatpush1.bf16.msra.mxu0 %v1343_v31 }
  0x9c   : > { %794 = vmatprep.subr.bf16.mxu0 %v1345_v60 }
  0x9f   : > { %795 = vmatpush1.bf16.msra.mxu0 %v1348_v62 }
 0x106   : > { %v332_v32 = vpop.xlane.xlu0 %331 }
 0x107   : > { %v343_v33 = vmul.f32 0.00390625, %v332_v32  ;;  %v338_v34 = vpop.xlane.xlu1 %337 }
 0x108   : > { %v345_v35 = vmul.f32 0.00390625, %v338_v34  ;;  %v1993_v34 = vshrl.u32 %v397_v27, 7 }
 0x109   : > { %v1929_v36 = vsub.f32 %v322_v0, %v343_v33  ;;  %v1931_v37 = vsub.f32 %v323_v1, %v343_v33  ;;  %v1350_v0 = vld [vmem:[%s1891_s0 + $0xf4] ss:$12 sps:$4 sm:$0xff]   ;;  %v1352_v1 = vld [vmem:[%s1891_s0 + $0xf8] ss:$12 sps:$4 sm:$0xff]  }
 0x10a   : > { %v1933_v38 = vsub.f32 %v326_v2, %v345_v35  ;;  %v1935_v39 = vsub.f32 %v327_v4, %v345_v35  ;;  %v335_v40 = vpop.xlane.xlu0 %334  ;;  %v1353_v2 = vld [vmem:[%s1891_s0 + $0xf0] ss:$12 sps:$4 sm:$0xff]   ;;  %796 = vmatprep.subr.bf16.mxu0 %v1350_v0  ;;  %1149 = vmatprep.subr.bf16.mxu1 %v1352_v1  ;;  %v1355_v4 = vld [vmem:[%s1891_s0 + $0x10c] ss:$12 sps:$4 sm:$0xff]  }
 0x10b   : > { %v344_v41 = vmul.f32 0.00390625, %v335_v40  ;;  %v341_v42 = vpop.xlane.xlu1 %340  ;;  %v355_v43 = vmul.f32 %v1929_v36, %v1929_v36  ;;  %v356_v44 = vmul.f32 %v1931_v37, %v1931_v37  ;;  %797 = vmatpush1.bf16.msra.mxu0 %v1353_v2  ;;  %1150 = vmatpush3.bf16.msra.mxu1 %v1354_v3 }
 0x10c   : > { %v346_v45 = vmul.f32 0.00390625, %v341_v42  ;;  %v359_v46 = vmul.f32 %v1933_v38, %v1933_v38  ;;  %v360_v47 = vmul.f32 %v1935_v39, %v1935_v39  ;;  %798 = vmatprep.subr.bf16.mxu0 %v1355_v4  ;;  %v399_v42 = vsub.s32 0, %v1993_v34 }
 0x10d   : > { %v1946_v48 = vsub.f32 %v1897_v5, %v344_v41  ;;  %v1949_v49 = vsub.f32 %v1899_v6, %v344_v41  ;;  %v363_v50 = vadd.f32 %v356_v44, %v355_v43  ;;  %v1357_v5 = vld [vmem:[%s1891_s0 + $0x110] ss:$12 sps:$4 sm:$0xff]   ;;  %v1358_v6 = vld [vmem:[%s1891_s0 + $0x108] ss:$12 sps:$4 sm:$0xff]   ;;  %v403_v43 = vsub.s32 1, %v1993_v34 }
 0x10e   : > { %v1952_v51 = vsub.f32 %v1901_v8, %v346_v45  ;;  %v1955_v52 = vsub.f32 %v1903_v9, %v346_v45  ;;  %v369_v53 = vadd.f32 %v360_v47, %v359_v46  ;;  %1151 = vmatprep.subr.bf16.mxu1 %v1357_v5  ;;  %v1360_v8 = vld [vmem:[%s1891_s0 + $0x124] ss:$12 sps:$4 sm:$0xff]   ;;  %v1362_v9 = vld [vmem:[%s1891_s0 + $0x128] ss:$12 sps:$4 sm:$0xff]   ;;  %v395_v44 = vld [vmem:[%s2122_s1] sm:$0x3] }
 0x10f   : > { %364 = vadd.xlane.f32.xlu0 %v363_v50  ;;  %v357_v54 = vmul.f32 %v1946_v48, %v1946_v48  ;;  %v358_v55 = vmul.f32 %v1949_v49, %v1949_v49  ;;  %799 = vmatpush1.bf16.msra.mxu0 %v1358_v6  ;;  %v400_v46 = vrot.slane %v395_v44, %v399_v42  ;;  %s1176_s0 = smul.u32 24, %s2168_s29 }
 0x110   : > { %v361_v56 = vmul.f32 %v1952_v51, %v1952_v51  ;;  %v362_v57 = vmul.f32 %v1955_v52, %v1955_v52  ;;  %1152 = vmatpush3.bf16.msra.mxu1 %v1359_v7  ;;  %800 = vmatprep.subr.bf16.mxu0 %v1360_v8  ;;  %v404_v47 = vrot.slane %v395_v44, %v403_v43 }
 0x111   : > { %v366_v58 = vadd.f32 %v358_v55, %v357_v54  ;;  %1153 = vmatprep.subr.bf16.mxu1 %v1362_v9  ;;  %s940_s7 = sadd.s32 %s1176_s0, %s2012_s10  ;;  %s2169_s10 = sld [smem:[#allocation20_spill]] }
 0x112   : > { %v372_v59 = vadd.f32 %v362_v57, %v361_v56  ;;  %s1131_s21 = sshll.u32 %s940_s7, 6 }
 0x113   : > { %370 = vadd.xlane.f32.xlu0 %v369_v53  ;;  %367 = vadd.xlane.f32.xlu1 %v366_v58  ;;  %v415_v53 = vld [vmem:[%s2165_s24] sm:$0x3] }
 0x114   : > { %801 = vmatpush1.bf16.msra.mxu0 %v1363_v10  ;;  %1154 = vmatpush3.bf16.msra.mxu1 %v1364_v11  ;;  %v420_v57 = vrot.slane %v415_v53, %v399_v42  ;;  %v424_v58 = vrot.slane %v415_v53, %v403_v43 }
 0x115   : > { %802 = vmatprep.subr.bf16.mxu0 %v1365_v12  ;;  %1155 = vmatprep.subr.bf16.mxu1 %v1367_v13 }
 0x117   : > { %373 = vadd.xlane.f32.xlu1 %v372_v59  ;;  %s2035_s11 = scalar_lea.hbm %s2169_s10, %s1131_s21 }
 0x118   : > { %803 = vmatpush1.bf16.msra.mxu0 %v1368_v14  ;;  %1156 = vmatpush3.bf16.msra.mxu1 %v1369_v15  ;;  %v515_v15 = vsub.s32 2, %v1993_v34 }
 0x119   : > { %804 = vmatprep.subr.bf16.mxu0 %v1370_v16  ;;  %1157 = vmatprep.subr.bf16.mxu1 %v1372_v17 }
 0x11c   : > { %805 = vmatpush1.bf16.msra.mxu0 %v1373_v18  ;;  %1158 = vmatpush3.bf16.msra.mxu1 %v1374_v19 }
 0x11d   : > { %806 = vmatprep.subr.bf16.mxu0 %v1375_v20  ;;  %1159 = vmatprep.subr.bf16.mxu1 %v1377_v21 }
 0x120   : > { %807 = vmatpush1.bf16.msra.mxu0 %v1378_v22  ;;  %1160 = vmatpush3.bf16.msra.mxu1 %v1379_v23 }
 0x19c   : > { %v365_v24 = vpop.xlane.xlu0 %364 }
 0x19d   : > { %v375_v25 = vmul.f32 0.00390625, %v365_v24 }
 0x19f   : > { %v379_v26 = vadd.f32 1e-05, %v375_v25 }
 0x1a0   : > { %v368_v28 = vpop.xlane.xlu1 %367  ;;  %v371_v29 = vpop.xlane.xlu0 %370 }
 0x1a1   : > { %1380 = vrsqrt.f32 %v379_v26  ;;  %v376_v30 = vmul.f32 0.00390625, %v368_v28  ;;  %v377_v31 = vmul.f32 0.00390625, %v371_v29 }
 0x1a3   : > { %v380_v32 = vadd.f32 1e-05, %v376_v30  ;;  %v381_v33 = vadd.f32 1e-05, %v377_v31 }
 0x1a4   : > { %v374_v35 = vpop.xlane.xlu1 %373 }
 0x1a5   : > { %1382 = vrsqrt.f32 %v380_v32  ;;  %v378_v40 = vmul.f32 0.00390625, %v374_v35 }
 0x1a6   : > { %1384 = vrsqrt.f32 %v381_v33 }
 0x1a7   : > { %v382_v41 = vadd.f32 1e-05, %v378_v40 }
 0x1a9   : > { %1386 = vrsqrt.f32 %v382_v41 }
 0x1ab   : > { %v1381_v45 = vpop.eup %1380 }
 0x1ac   : > { %v388_v50 = vmul.f32 %v1381_v45, %v1931_v37  ;;  %v387_v54 = vmul.f32 %v1381_v45, %v1929_v36 }
 0x1ae   : > { %v408_v56 = vmul.f32 %v404_v47, %v388_v50  ;;  %v407_v59 = vmul.f32 %v400_v46, %v387_v54 }
 0x1af   : > { %v1383_v55 = vpop.eup %1382 }
 0x1b0   : > { %v1385_v60 = vpop.eup %1384  ;;  %v390_v61 = vmul.f32 %v1383_v55, %v1949_v49  ;;  %v389_v62 = vmul.f32 %v1383_v55, %v1946_v48  ;;  %v428_v2 = vadd.f32 %v424_v58, %v408_v56  ;;  %v427_v3 = vadd.f32 %v420_v57, %v407_v59 }
 0x1b1   : > { %v392_v63 = vmul.f32 %v1385_v60, %v1935_v39  ;;  %v391_v8 = vmul.f32 %v1385_v60, %v1933_v38 }
 0x1b2   : > { %v410_v0 = vmul.f32 %v404_v47, %v390_v61  ;;  %v409_v37 = vmul.f32 %v400_v46, %v389_v62 }
 0x1b3   : > { %v1387_v1 = vpop.eup %1386  ;;  %v412_v4 = vmul.f32 %v404_v47, %v392_v63  ;;  %v411_v12 = vmul.f32 %v400_v46, %v391_v8 }
 0x1b4   : > { %v430_v5 = vadd.f32 %v424_v58, %v410_v0  ;;  %v429_v36 = vadd.f32 %v420_v57, %v409_v37  ;;  %v394_v6 = vmul.f32 %v1387_v1, %v1955_v52  ;;  %v393_v7 = vmul.f32 %v1387_v1, %v1952_v51  ;;  %v503_v52 = vld [vmem:[%s317_s27] sm:$0x7]  ;;  %s1452_s27 = sshll.u32 %s1607_s2, 4  ;;  %s1453_s27 = int_to_ptr.vmem [resolvable:$false] %s1452_s27 }
 0x1b5   : > { %v432_v39 = vadd.f32 %v424_v58, %v412_v4  ;;  %v431_v51 = vadd.f32 %v420_v57, %v411_v12  ;;  %v508_v16 = vrot.slane %v503_v52, %v399_v42  ;;  %v512_v17 = vrot.slane %v503_v52, %v403_v43  ;;  %s1454_s29 = scalar_lea.vmem %s1453_s27, 1536  ;;  %p1455_p10 = scmp.lt.s32.totalorder %s2038_s8, %s1453_s27 }
 0x1b6   : > { %v436_v9 = vpack.c.bf16 %v430_v5, %v428_v2  ;;  %v435_v49 = vpack.c.bf16 %v429_v36, %v427_v3  ;;  %v414_v10 = vmul.f32 %v404_v47, %v394_v6  ;;  %v413_v48 = vmul.f32 %v400_v46, %v393_v7  ;;  %p1456_p8 = scmp.lt.s32.totalorder %s1454_s29, %s1448_s16 }
 0x1b7   : > { %v516_v20 = vrot.slane %v503_v52, %v515_v15 }
 0x1b8   : > { %808 = vmatprep.mubr.bf16.mxu0 %v436_v9  ;;  %861 = vmatprep.mubr.bf16.mxu1 %v436_v9  ;;  %v434_v11 = vadd.f32 %v424_v58, %v414_v10  ;;  %v433_v14 = vadd.f32 %v420_v57, %v413_v48  ;;  %p1457_p5 = por %p1456_p8, %p1455_p10 }
 0x1b9   : > { %809 = vmatmul.mubr.bf16.vlgmr.msra.gmra.mrb[0].mxu0 %v435_v49  ;;  %862 = vmatmul.mubr.bf16.vlgmr.msra.gmra.mrb[0].mxu1 %v435_v49 }
 0x1ba   : > { %v438_v13 = vpack.c.bf16 %v434_v11, %v432_v39  ;;  %v437_v38 = vpack.c.bf16 %v433_v14, %v431_v51  ;;  %p1458_p0 = pnand %p1457_p5, %p1451_p2 }
 0x1bc   : > { %818 = vmatprep.mubr.bf16.mxu0 %v438_v13  ;;  %869 = vmatprep.mubr.bf16.mxu1 %v438_v13 }
 0x1c1   : > { %819 = vmatmul.mubr.bf16.gmra.mrb[4].mxu0 %v437_v38  ;;  %870 = vmatmul.mubr.bf16.gmra.mrb[4].mxu1 %v437_v38 }
 0x28c   : > { %v810_v18 = vpop.f32.mrb[0].mxu0  ;;  %v1161_v19 = vpop.f32.mrb[0].mxu1 }
 0x28d   : > { %v811_v21 = vadd.f32 %v810_v18, %v508_v16  ;;  %v812_v22 = vpop.f32.mrb[1].mxu0  ;;  %v1162_v23 = vpop.f32.mrb[1].mxu1 }
 0x28e   : > { %v813_v24 = vadd.f32 %v812_v22, %v512_v17  ;;  %v1163_v25 = vadd.f32 %v1162_v23, %v1161_v19  ;;  %v814_v26 = vpop.f32.mrb[2].mxu0  ;;  %v1164_v27 = vpop.f32.mrb[2].mxu1 }
 0x28f   : > { %v815_v28 = vadd.f32 %v814_v26, %v508_v16  ;;  %v816_v29 = vpop.f32.mrb[3].mxu0  ;;  %v1165_v30 = vpop.f32.mrb[3].mxu1 }
 0x290   : > { %v1137_v31 = vpack.c.bf16 %v813_v24, %v811_v21  ;;  %v864_v32 = vadd.f32 %v1163_v25, %v516_v20  ;;  %v817_v33 = vadd.f32 %v816_v29, %v512_v17  ;;  %v1166_v34 = vadd.f32 %v1165_v30, %v1164_v27 }
 0x292   : > { %918 = vst [vmem:[%s2024_s12] sm:$0xff] %v1137_v31  ;;  %v1138_v35 = vpack.c.bf16 %v864_v32, %v864_v32  ;;  %v1139_v40 = vpack.c.bf16 %v817_v33, %v815_v28  ;;  %v867_v41 = vadd.f32 %v1166_v34, %v516_v20 }
 0x294   : > { %919 = vst [vmem:[%s2024_s12 + $0x8] sm:$0xf] %v1138_v35  ;;  %920 = vst [vmem:[%s2024_s12 + $0xc] sm:$0xff] %v1139_v40  ;;  %v1140_v42 = vpack.c.bf16 %v867_v41, %v867_v41  ;;  %v820_v43 = vpop.f32.mrb[4].mxu0  ;;  %v1167_v44 = vpop.f32.mrb[4].mxu1 }
 0x295   : > { %v821_v45 = vadd.f32 %v820_v43, %v508_v16  ;;  %v822_v46 = vpop.f32.mrb[5].mxu0  ;;  %v1168_v47 = vpop.f32.mrb[5].mxu1 }
 0x296   : > { %921 = vst [vmem:[%s2024_s12 + $0x14] sm:$0xf] %v1140_v42  ;;  %v823_v50 = vadd.f32 %v822_v46, %v512_v17  ;;  %v1169_v53 = vadd.f32 %v1168_v47, %v1167_v44  ;;  %v824_v54 = vpop.f32.mrb[6].mxu0  ;;  %v1170_v55 = vpop.f32.mrb[6].mxu1 }
 0x297   : > { %v825_v56 = vadd.f32 %v824_v54, %v508_v16  ;;  %v826_v57 = vpop.f32.mrb[7].mxu0  ;;  %v1171_v58 = vpop.f32.mrb[7].mxu1 }
 0x298   : > { %v1141_v59 = vpack.c.bf16 %v823_v50, %v821_v45  ;;  %v872_v60 = vadd.f32 %v1169_v53, %v516_v20  ;;  %v827_v61 = vadd.f32 %v826_v57, %v512_v17  ;;  %v1172_v62 = vadd.f32 %v1171_v58, %v1170_v55 }
 0x29a   : > { %922 = vst [vmem:[%s2024_s12 + $0x18] sm:$0xff] %v1141_v59  ;;  %v1142_v63 = vpack.c.bf16 %v872_v60, %v872_v60  ;;  %v1143_v0 = vpack.c.bf16 %v827_v61, %v825_v56  ;;  %v875_v37 = vadd.f32 %v1172_v62, %v516_v20 }
 0x29c   : > { %923 = vst [vmem:[%s2024_s12 + $0x20] sm:$0xf] %v1142_v63  ;;  %924 = vst [vmem:[%s2024_s12 + $0x24] sm:$0xff] %v1143_v0  ;;  %v1144_v1 = vpack.c.bf16 %v875_v37, %v875_v37 }
 0x29e   : > { %925 = vst [vmem:[%s2024_s12 + $0x2c] sm:$0xf] %v1144_v1 }
 0x29f   : > { %1461 = shalt.err (!%p1458_p0)
}
 0x2a0   : > { %s1462_s13 = scalar_lea.hbm %s2035_s11, 768  ;;  %s1466_s12 = scalar_lea.hbm %s2169_s10, 3072 }
 0x2a1   : > { %p1463_p4 = scmp.ne.s32.totalorder %s2035_s11, %s1462_s13  ;;  %p1467_p13 = scmp.lt.u32.totalorder %s2035_s11, %s2169_s10 }
 0x2a2   : > { %p1468_p1 = scmp.lt.u32.totalorder %s1466_s12, %s1462_s13  ;;  %p1470_p12 = scmp.lt.u32.totalorder %s1462_s13, %s2035_s11 }
 0x2a3   : > { %p1464_p3 = pnand %p1463_p4, %p2170_p9 }
 0x2a4   : > { %p1469_p6 = por %p1468_p1, %p1467_p13 }
 0x2a5   : > { %p1465_p7 = pneg %p1464_p3 }
 0x2a6   : > { %p1471_p11 = por %p1470_p12, %p1469_p6 }
 0x2a8   : > { %p1472_p2 = pnand %p1471_p11, %p1465_p7 }
 0x2aa   : > { %1475 = shalt.err (!%p1472_p2)
}
 0x2ab   : > { %s1608_s24 = smov 192   ;;  %s1609_s30 = smov 384  }
 0x2ac   : > { %s1610_s16 = smov 12  }
 0x2ad   : > { %1181 = dma.vmem_to_hbm [thread:$0]  (%p2170_p9), %s2038_s8, 768, %s2035_s11, %s2045_s9, %s1608_s24, %s1609_s30, %s1610_s16  }
 0x2ae PF: > { %p1195_p10 = scmp.ge.s32.totalorder %s1598_s6, 2  ;;  %s958_s2 = sand.u32 1, %s1546_s18  }
 0x2af   : > { %p2171_p8 = scmp.ne.s32.totalorder %s2160_s15, 0  ;;  %s959_s27 = scalar_lea.sflag [#allocation4], %s958_s2 }
 0x2b1   : > { %p1191_p5 = pnand %p1195_p10, %p2171_p8 }
 0x2b3   : > { %1541 = dma.done.wait (!%p1191_p5), %s959_s27, 768  }
 0x2b4   : > { %1543 = vsyncadd (!%p1191_p5), %s959_s27, 4294966528  ;;  %s24_s6 = sadd.s32 1, %s1598_s6   ;;  %s2173_s27 = sld [smem:[#allocation13_spill]] }
 0x2b5   : > { %p2074_p0 = scmp.ge.s32.totalorder %s24_s6, 6   ;;  %s2174_s17 = sld [smem:[#allocation14_spill]] }
 0x2b6   : > { %s2175_s15 = sld [smem:[#allocation15_spill]]  ;;  %s2176_s30 = sld [smem:[#allocation16_spill]] }
 0x2b7   : > { %s2178_s18 = smov %s1550_s19  ;;  %s2179_s19 = smov %s1554_s20 }
 0x2b8   : > { %s2180_s20 = smov %s1832_s4  ;;  %s2181_s21 = smov %s1562_s22 }
 0x2b9   : > { %s2182_s22 = smov %s1566_s23  ;;  %s2183_s23 = smov %s1814_s28 }
 0x2ba   : > { %s2184_s24 = smov %s1574_s25  ;;  %s2185_s25 = smov %s1578_s26 }
 0x2bb   : > { %s2186_s26 = smov %s1829_s14  ;;  %s2187_s28 = smov %s2174_s17 }
 0x2bc   : > { %s2188_s29 = smov %s2175_s15  ;;  %23 = sbr.rel (!%p2074_p0) target bundleno = 17 (0x11), region = 101 }
 0x2c3   :  { %964 = vsyncpa [#allocation3], 1 }
 0x2c4   :  { %966 = vsyncpa [#allocation3 + $0x1], 1 }
 0x2c5   :  { %967 = vsyncpa [#allocation6], 1 }
 0x2c6   :  { %969 = vsyncpa [#allocation6 + $0x1], 1 }
 0x2c7   :  { %970 = vsyncpa [#allocation4], 1 }
 0x2c8   :  { %972 = vsyncpa [#allocation4 + $0x1], 1 }

</bundles_post_ra>
